<compile_context>
chip_gen: v7x
topology: tpu7x:2x2x1
jax: 0.10.0
libtpu: 0.0.40
codegen_flags: <defaults>
</compile_context>

<pallas_src>
import jax
import jax.numpy as jnp
from jax.experimental import pallas as pl
from jax.experimental.pallas import tpu as pltpu

SEG_ALPHA = 1.0
CLS_ALPHA = 1.0
SMOOTH_NR = 1e-5
SMOOTH_DR = 1e-5


def _round_up(x, m):
    return (x + m - 1) // m * m


def _tpu_params():
    """(vmem_capacity_bytes, tensorcore_count) with safe fallbacks."""
    vmem = 128 << 20
    cores = 1
    try:
        info = pltpu.get_tpu_info()
        vmem = int(getattr(info, "vmem_capacity_bytes", vmem) or vmem)
        for name in ("num_cores", "core_count", "num_tensorcores",
                     "tensorcore_count", "cores_per_chip"):
            v = getattr(info, name, None)
            if v:
                cores = int(v)
                break
        else:
            # v7x reports 64 MiB per-TC VMEM and has 2 TCs; v5e/v6e have 128 MiB / 1 TC.
            cores = 2 if vmem <= (64 << 20) else 1
    except Exception:
        pass
    return max(vmem, 32 << 20), max(1, min(int(cores), 4))


def _pick_tile_n(B, C, N, logit_itemsize, label_itemsize, vmem_capacity):
    """Largest lane-dense tile (multiple of 128, <= 32768) whose double-buffered
    input blocks + in-kernel f32 temporaries fit the generation's VMEM."""
    n128 = _round_up(N, 128)
    per_col = (2 * (B * C * logit_itemsize + B * label_itemsize)   # 2x buffered inputs
               + 6 * B * C * 4                                     # e/probs/select temporaries
               + 2 * B * 4)                                        # m/z/inv_z slabs
    budget = int(0.6 * vmem_capacity)
    cap = max(128, (budget // per_col) // 128 * 128)
    return int(min(n128, 32768, cap))


def _make_dice_partial_kernel(B, C):
    """Per-tile partial Dice sums: accumulate intersection and (sum_p + sum_t)
    per (b, c) into the revisited (B, C) output block of the current split."""

    def kernel(seg_logits_ref, seg_labels_ref, inter_ref, denom_ref):
        t = pl.program_id(1)

        @pl.when(t == 0)
        def _():
            inter_ref[...] = jnp.zeros_like(inter_ref)
            denom_ref[...] = jnp.zeros_like(denom_ref)

        logits = seg_logits_ref[...].astype(jnp.float32)   # (B, C, tile_n)
        labels = seg_labels_ref[...].astype(jnp.int32)     # (B, tile_n)

        # Channel softmax: exp + one reciprocal per pixel column (EUP), then a
        # broadcast multiply instead of B*C*tile_n divides.  Tail-padded
        # columns (zero logits) yield uniform 1/C probs; corrected in finalize.
        m = jnp.max(logits, axis=1, keepdims=True)          # (B, 1, tile_n)
        e = jnp.exp(logits - m)                             # (B, C, tile_n)
        z = jnp.sum(e, axis=1, keepdims=True)               # (B, 1, tile_n)
        inv_z = pl.reciprocal(z, approx=False)
        probs = e * inv_z                                    # (B, C, tile_n)

        # Boolean one-hot mask; no f32 one-hot tensor materialized.
        # Padded labels == -1 never match any channel.
        ch = jax.lax.broadcasted_iota(jnp.int32, logits.shape, 1)
        onehot = ch == labels[:, None, :]

        inter_ref[...] += jnp.sum(jnp.where(onehot, probs, 0.0), axis=2)
        denom_ref[...] += (jnp.sum(probs, axis=2)
                           + jnp.sum(jnp.where(onehot, 1.0, 0.0), axis=2))
        # TODO(synk): when B*C % 8 == 0, repack to (B*C, tile_n) and replace the
        # axis=1 reductions with a roll-based group tree; offload sum_p to the
        # idle MXU (probs_2d @ ones) on the VPU-bound v6e/v7x path.

    return kernel


def _make_finalize_kernel(B, C, K, seg_alpha, cls_alpha, pad_correction):
    """Tiny once-only kernel: combine per-split partial sums (with the analytic
    tail-padding correction), compute the (B, K) cross-entropy, emit scalars."""

    def kernel(inter_ref, denom_ref, cls_logits_ref, cls_labels_ref,
               total_ref, seg_ref, cls_ref):
        inter = jnp.sum(inter_ref[...], axis=0)                      # (B, C)
        denom = jnp.sum(denom_ref[...], axis=0) - pad_correction     # (B, C)
        dice = 1.0 - (2.0 * inter + SMOOTH_NR) / (denom + SMOOTH_DR)
        loss_seg = jnp.mean(dice)

        logits = cls_logits_ref[...]                                 # (B, K)
        labels = cls_labels_ref[...]                                 # (B, 1)
        cm = jnp.max(logits, axis=1, keepdims=True)
        lse = jnp.log(jnp.sum(jnp.exp(logits - cm), axis=1, keepdims=True)) + cm
        k_iota = jax.lax.broadcasted_iota(jnp.int32, (B, K), 1)
        tgt = jnp.sum(jnp.where(k_iota == labels, logits, 0.0), axis=1, keepdims=True)
        loss_cls = jnp.mean(lse - tgt)

        seg_ref[...] = jnp.reshape(loss_seg, (1, 1))
        cls_ref[...] = jnp.reshape(loss_cls, (1, 1))
        total_ref[...] = jnp.reshape(seg_alpha * loss_seg + cls_alpha * loss_cls, (1, 1))

    return kernel


def multitask_loss(seg_output, seg_target, cls_output, cls_target, *,
                   seg_alpha=SEG_ALPHA, cls_alpha=CLS_ALPHA,
                   tile_n=None, n_splits=None):
    """seg_output: (B,C,H,W) f32/bf16 logits, seg_target: (B,1,H,W) int labels,
       cls_output: (B,K) f32 logits,          cls_target: (B,) int labels."""
    B, C, H, W = seg_output.shape
    K = cls_output.shape[1]
    N = H * W

    compute_dtype = seg_output.dtype if seg_output.dtype == jnp.bfloat16 else jnp.float32
    label_dtype = jnp.int8 if C <= 127 else jnp.int32
    seg_logits = seg_output.astype(compute_dtype).reshape(B, C, N)
    seg_labels = seg_target.astype(label_dtype).reshape(B, N)

    vmem_cap, num_cores = _tpu_params()
    logit_isz = jnp.dtype(compute_dtype).itemsize
    label_isz = jnp.dtype(label_dtype).itemsize

    if tile_n is None:
        tile_n = _pick_tile_n(B, C, N, logit_isz, label_isz, vmem_cap)
    assert tile_n % 128 == 0, "tile_n must be a multiple of 128 (lane width)"

    n_tiles = -(-N // tile_n)
    if n_splits is None:
        n_splits = num_cores if n_tiles >= num_cores else 1
    n_splits = max(1, min(int(n_splits), n_tiles))

    n_pad = _round_up(N, tile_n * n_splits)
    tiles_per_split = n_pad // (tile_n * n_splits)

    if n_pad != N:
        seg_logits = jnp.pad(seg_logits, ((0, 0), (0, 0), (0, n_pad - N)))
        seg_labels = jnp.pad(seg_labels, ((0, 0), (0, n_pad - N)), constant_values=-1)

    # VMEM budget: 2x double-buffered input blocks + in-kernel f32 temporaries,
    # clamped per generation (v7x has only 64 MiB per TensorCore).
    block_in = B * C * tile_n * logit_isz + B * tile_n * label_isz
    needed = 2 * block_in + 6 * B * C * tile_n * 4 + (4 << 20)
    vmem_limit = int(max(16 << 20, min(max(32 << 20, needed), int(0.85 * vmem_cap))))

    dice_kernel = _make_dice_partial_kernel(B, C)
    inter_p, denom_p = pl.pallas_call(
        dice_kernel,
        out_shape=(jax.ShapeDtypeStruct((n_splits, B, C), jnp.float32),
                   jax.ShapeDtypeStruct((n_splits, B, C), jnp.float32)),
        grid=(n_splits, tiles_per_split),
        in_specs=[
            pl.BlockSpec((B, C, tile_n),
                         lambda s, t: (0, 0, s * tiles_per_split + t)),
            pl.BlockSpec((B, tile_n),
                         lambda s, t: (0, s * tiles_per_split + t)),
        ],
        out_specs=(
            pl.BlockSpec((None, B, C), lambda s, t: (s, 0, 0)),
            pl.BlockSpec((None, B, C), lambda s, t: (s, 0, 0)),
        ),
        compiler_params=pltpu.CompilerParams(
            dimension_semantics=("parallel", "arbitrary"),
            vmem_limit_bytes=vmem_limit,
        ),
    )(seg_logits, seg_labels)

    cls_logits = cls_output.astype(jnp.float32)
    cls_labels = cls_target.astype(jnp.int32).reshape(B, 1)

    # Padded zero-logit columns contributed exactly (n_pad - N)/C to every
    # denom[b, c]; subtract it analytically instead of masking in the hot loop.
    pad_correction = float(n_pad - N) / float(C)

    finalize_kernel = _make_finalize_kernel(B, C, K, float(seg_alpha),
                                            float(cls_alpha), pad_correction)
    total, loss_seg, loss_cls = pl.pallas_call(
        finalize_kernel,
        out_shape=(jax.ShapeDtypeStruct((1, 1), jnp.float32),
                   jax.ShapeDtypeStruct((1, 1), jnp.float32),
                   jax.ShapeDtypeStruct((1, 1), jnp.float32)),
        in_specs=[pl.BlockSpec(memory_space=pltpu.MemorySpace.VMEM)] * 4,
        out_specs=(pl.BlockSpec(memory_space=pltpu.MemorySpace.VMEM),
                   pl.BlockSpec(memory_space=pltpu.MemorySpace.VMEM),
                   pl.BlockSpec(memory_space=pltpu.MemorySpace.VMEM)),
    )(inter_p, denom_p, cls_logits, cls_labels)

    return total[0, 0], loss_seg[0, 0], loss_cls[0, 0]


def _reference(seg_output, seg_target, cls_output, cls_target):
    B, C, H, W = seg_output.shape
    probs = jax.nn.softmax(seg_output.astype(jnp.float32), axis=1)
    onehot = jax.nn.one_hot(seg_target.reshape(B, H, W).astype(jnp.int32), C,
                            axis=1, dtype=jnp.float32)
    inter = jnp.sum(probs * onehot, axis=(2, 3))
    denom = jnp.sum(probs, axis=(2, 3)) + jnp.sum(onehot, axis=(2, 3))
    loss_seg = jnp.mean(1.0 - (2.0 * inter + SMOOTH_NR) / (denom + SMOOTH_DR))
    logp = jax.nn.log_softmax(cls_output.astype(jnp.float32), axis=1)
    loss_cls = -jnp.mean(jnp.take_along_axis(
        logp, cls_target.astype(jnp.int32)[:, None], axis=1))
    return SEG_ALPHA * loss_seg + CLS_ALPHA * loss_cls, loss_seg, loss_cls


if __name__ == "__main__":
    def _check(B, C, H, W, K, dtype=jnp.float32, tol=1e-5, tile_n=None, n_splits=None):
        key = jax.random.PRNGKey(0)
        k1, k2, k3, k4 = jax.random.split(key, 4)
        seg_output = jax.random.normal(k1, (B, C, H, W), dtype=jnp.float32).astype(dtype)
        seg_target = jax.random.randint(k2, (B, 1, H, W), 0, C, dtype=jnp.int32)
        cls_output = jax.random.normal(k3, (B, K), dtype=jnp.float32)
        cls_target = jax.random.randint(k4, (B,), 0, K, dtype=jnp.int32)

        out = multitask_loss(seg_output, seg_target, cls_output, cls_target,
                             tile_n=tile_n, n_splits=n_splits)
        jax.block_until_ready(out)
        ref = _reference(seg_output, seg_target, cls_output, cls_target)
        for got, want in zip(out, ref):
            assert jnp.allclose(got, want, rtol=tol, atol=tol), (got, want)

    # Module-spec shape: single tile, no padding, single split.
    _check(B=2, C=4, H=16, W=16, K=4)
    # Gridded path: many tiles, forced 2-way parallel split, analytic tail correction.
    _check(B=2, C=4, H=40, W=40, K=4, tile_n=128, n_splits=2)
    # bf16 logits path (kernel upcasts to f32 before any math) + auto tile with tail pad.
    _check(B=2, C=4, H=24, W=24, K=4, dtype=jnp.bfloat16, tol=1e-4)

    print("KERNEL_OK")
</pallas_src>

<mosaic_0001>
module attributes {stable_mosaic.version = 11 : i64} {
  func.func @kernel(%arg0: i32, %arg1: i32, %arg2: memref<2x4x256xf32, #tpu.memory_space<vmem>>, %arg3: memref<2x256xi8, #tpu.memory_space<vmem>>, %arg4: memref<1x2x4xf32, #tpu.memory_space<vmem>>, %arg5: memref<1x2x4xf32, #tpu.memory_space<vmem>>) attributes {dimension_semantics = [#tpu.dimension_semantics<parallel>, #tpu.dimension_semantics<arbitrary>], iteration_bounds = array<i64: 1, 1>, scalar_prefetch = 0 : i64, scratch_operands = 0 : i64, tpu.core_type = #tpu.core_type<tc>, window_params = [{transform_indices = @transform_0, window_bounds = array<i64: 2, 4, 256>}, {transform_indices = @transform_1, window_bounds = array<i64: 2, 256>}, {transform_indices = @transform_2, window_bounds = array<i64: 1, 2, 4>}, {transform_indices = @transform_3, window_bounds = array<i64: 1, 2, 4>}]} {
    %c0_i32 = arith.constant 0 : i32
    %0 = arith.cmpi eq, %arg1, %c0_i32 : i32
    %1 = arith.extui %0 : i1 to i32
    %c0_i32_0 = arith.constant 0 : i32
    %2 = arith.cmpi ne, %1, %c0_i32_0 : i32
    scf.if %2 {
      %cst_24 = arith.constant 0.000000e+00 : f32
      %41 = vector.broadcast %cst_24 : f32 to vector<2x4xf32>
      %c0_25 = arith.constant 0 : index
      %c0_26 = arith.constant 0 : index
      %c0_27 = arith.constant 0 : index
      %42 = vector.load %arg4[%c0_25, %c0_26, %c0_27] : memref<1x2x4xf32, #tpu.memory_space<vmem>>, vector<1x2x4xf32>
      %43 = vector.shape_cast %42 : vector<1x2x4xf32> to vector<2x4xf32>
      %44 = vector.shape_cast %41 : vector<2x4xf32> to vector<1x2x4xf32>
      tpu.vector_store %arg4[%c0_25, %c0_26, %c0_27], %44 {strides = array<i32>} : memref<1x2x4xf32, #tpu.memory_space<vmem>>, vector<1x2x4xf32>,
      %cst_28 = arith.constant 0.000000e+00 : f32
      %45 = vector.broadcast %cst_28 : f32 to vector<2x4xf32>
      %c0_29 = arith.constant 0 : index
      %c0_30 = arith.constant 0 : index
      %c0_31 = arith.constant 0 : index
      %46 = vector.load %arg5[%c0_29, %c0_30, %c0_31] : memref<1x2x4xf32, #tpu.memory_space<vmem>>, vector<1x2x4xf32>
      %47 = vector.shape_cast %46 : vector<1x2x4xf32> to vector<2x4xf32>
      %48 = vector.shape_cast %45 : vector<2x4xf32> to vector<1x2x4xf32>
      tpu.vector_store %arg5[%c0_29, %c0_30, %c0_31], %48 {strides = array<i32>} : memref<1x2x4xf32, #tpu.memory_space<vmem>>, vector<1x2x4xf32>,
    } else {
    }
    %c0 = arith.constant 0 : index
    %c0_1 = arith.constant 0 : index
    %c0_2 = arith.constant 0 : index
    %3 = vector.load %arg2[%c0, %c0_1, %c0_2] : memref<2x4x256xf32, #tpu.memory_space<vmem>>, vector<2x4x256xf32>
    %c0_3 = arith.constant 0 : index
    %c0_4 = arith.constant 0 : index
    %4 = vector.load %arg3[%c0_3, %c0_4] : memref<2x256xi8, #tpu.memory_space<vmem>>, vector<2x256xi8>
    %5 = arith.extsi %4 : vector<2x256xi8> to vector<2x256xi32>
    %cst = arith.constant dense<0xFF800000> : vector<2x256xf32>
    %6 = vector.multi_reduction <maximumf>, %3, %cst [1] : vector<2x4x256xf32> to vector<2x256xf32>
    %7 = vector.shape_cast %6 : vector<2x256xf32> to vector<2x1x256xf32>
    %8 = vector.broadcast %7 : vector<2x1x256xf32> to vector<2x4x256xf32>
    %9 = arith.subf %3, %8 : vector<2x4x256xf32>
    %10 = math.exp %9 : vector<2x4x256xf32>
    %cst_5 = arith.constant dense<0.000000e+00> : vector<2x256xf32>
    %11 = vector.multi_reduction <add>, %10, %cst_5 [1] : vector<2x4x256xf32> to vector<2x256xf32>
    %12 = vector.shape_cast %11 : vector<2x256xf32> to vector<2x1x256xf32>
    %13 = tpu.reciprocal %12 : vector<2x1x256xf32> -> vector<2x1x256xf32>
    %14 = vector.broadcast %13 : vector<2x1x256xf32> to vector<2x4x256xf32>
    %15 = arith.mulf %10, %14 : vector<2x4x256xf32>
    %16 = tpu.iota {dimensions = array<i32: 1>} : vector<2x4x256xi32>
    %17 = vector.shape_cast %5 : vector<2x256xi32> to vector<2x1x256xi32>
    %18 = vector.broadcast %17 : vector<2x1x256xi32> to vector<2x4x256xi32>
    %19 = arith.cmpi eq, %16, %18 : vector<2x4x256xi32>
    %c0_6 = arith.constant 0 : index
    %c0_7 = arith.constant 0 : index
    %c0_8 = arith.constant 0 : index
    %20 = vector.load %arg4[%c0_6, %c0_7, %c0_8] : memref<1x2x4xf32, #tpu.memory_space<vmem>>, vector<1x2x4xf32>
    %21 = vector.shape_cast %20 : vector<1x2x4xf32> to vector<2x4xf32>
    %cst_9 = arith.constant 0.000000e+00 : f32
    %22 = vector.broadcast %cst_9 : f32 to vector<2x4x256xf32>
    %23 = arith.select %19, %15, %22 : vector<2x4x256xi1>, vector<2x4x256xf32>
    %cst_10 = arith.constant dense<0.000000e+00> : vector<2x4xf32>
    %24 = vector.multi_reduction <add>, %23, %cst_10 [2] : vector<2x4x256xf32> to vector<2x4xf32>
    %25 = arith.addf %21, %24 : vector<2x4xf32>
    %c0_11 = arith.constant 0 : index
    %c0_12 = arith.constant 0 : index
    %c0_13 = arith.constant 0 : index
    %26 = vector.load %arg4[%c0_11, %c0_12, %c0_13] : memref<1x2x4xf32, #tpu.memory_space<vmem>>, vector<1x2x4xf32>
    %27 = vector.shape_cast %26 : vector<1x2x4xf32> to vector<2x4xf32>
    %28 = vector.shape_cast %25 : vector<2x4xf32> to vector<1x2x4xf32>
    tpu.vector_store %arg4[%c0_11, %c0_12, %c0_13], %28 {strides = array<i32>} : memref<1x2x4xf32, #tpu.memory_space<vmem>>, vector<1x2x4xf32>,
    %c0_14 = arith.constant 0 : index
    %c0_15 = arith.constant 0 : index
    %c0_16 = arith.constant 0 : index
    %29 = vector.load %arg5[%c0_14, %c0_15, %c0_16] : memref<1x2x4xf32, #tpu.memory_space<vmem>>, vector<1x2x4xf32>
    %30 = vector.shape_cast %29 : vector<1x2x4xf32> to vector<2x4xf32>
    %cst_17 = arith.constant dense<0.000000e+00> : vector<2x4xf32>
    %31 = vector.multi_reduction <add>, %15, %cst_17 [2] : vector<2x4x256xf32> to vector<2x4xf32>
    %cst_18 = arith.constant 1.000000e+00 : f32
    %cst_19 = arith.constant 0.000000e+00 : f32
    %32 = vector.broadcast %cst_18 : f32 to vector<2x4x256xf32>
    %33 = vector.broadcast %cst_19 : f32 to vector<2x4x256xf32>
    %34 = arith.select %19, %32, %33 : vector<2x4x256xi1>, vector<2x4x256xf32>
    %cst_20 = arith.constant dense<0.000000e+00> : vector<2x4xf32>
    %35 = vector.multi_reduction <add>, %34, %cst_20 [2] : vector<2x4x256xf32> to vector<2x4xf32>
    %36 = arith.addf %31, %35 : vector<2x4xf32>
    %37 = arith.addf %30, %36 : vector<2x4xf32>
    %c0_21 = arith.constant 0 : index
    %c0_22 = arith.constant 0 : index
    %c0_23 = arith.constant 0 : index
    %38 = vector.load %arg5[%c0_21, %c0_22, %c0_23] : memref<1x2x4xf32, #tpu.memory_space<vmem>>, vector<1x2x4xf32>
    %39 = vector.shape_cast %38 : vector<1x2x4xf32> to vector<2x4xf32>
    %40 = vector.shape_cast %37 : vector<2x4xf32> to vector<1x2x4xf32>
    tpu.vector_store %arg5[%c0_21, %c0_22, %c0_23], %40 {strides = array<i32>} : memref<1x2x4xf32, #tpu.memory_space<vmem>>, vector<1x2x4xf32>,
    return
  }
  func.func @transform_0(%arg0: i32, %arg1: i32) -> (i32, i32, i32) {
    %c1_i32 = arith.constant 1 : i32
    %0 = arith.muli %arg0, %c1_i32 : i32
    %1 = arith.addi %0, %arg1 : i32
    %c0_i32 = arith.constant 0 : i32
    %c0_i32_0 = arith.constant 0 : i32
    %c0_i32_1 = arith.constant 0 : i32
    return %c0_i32, %c0_i32_0, %1 : i32, i32, i32
  }
  func.func @transform_1(%arg0: i32, %arg1: i32) -> (i32, i32) {
    %c1_i32 = arith.constant 1 : i32
    %0 = arith.muli %arg0, %c1_i32 : i32
    %1 = arith.addi %0, %arg1 : i32
    %c0_i32 = arith.constant 0 : i32
    %c0_i32_0 = arith.constant 0 : i32
    return %c0_i32, %1 : i32, i32
  }
  func.func @transform_2(%arg0: i32, %arg1: i32) -> (i32, i32, i32) {
    %c0_i32 = arith.constant 0 : i32
    %c0_i32_0 = arith.constant 0 : i32
    %c0_i32_1 = arith.constant 0 : i32
    return %arg0, %c0_i32, %c0_i32_0 : i32, i32, i32
  }
  func.func @transform_3(%arg0: i32, %arg1: i32) -> (i32, i32, i32) {
    %c0_i32 = arith.constant 0 : i32
    %c0_i32_0 = arith.constant 0 : i32
    %c0_i32_1 = arith.constant 0 : i32
    return %arg0, %c0_i32, %c0_i32_0 : i32, i32, i32
  }
}

</mosaic_0001>

<bundles_post_ra>
// kernel: tpu_custom_call.1
= control target key start
LH: loop header
LB: loop body
LE: loop exit
PB: predicated region body
PF: predicated region fallthrough
CT: control target
= control target key end

     0   :  { %9 = vsyncpa [#allocation3], 0  ;;  %s555_s0 = inlined_call_operand.hbm [shape: f32[2,4,256], index: 0, kind: input, shape index: {}]   ;;  %s556_s1 = inlined_call_operand.vmem [shape: s8[2,256], index: 1, kind: input, shape index: {}]   ;;  %s557_s2 = inlined_call_operand.hbm [shape: f32[1,2,4], index: 2, kind: output, shape index: {0}]   ;;  %s558_s3 = inlined_call_operand.hbm [shape: f32[1,2,4], index: 3, kind: output, shape index: {1}]  }
   0x1   :  { %10 = vsyncpa [#allocation4], 0 }
   0x2   :  { %11 = vsyncpa [#allocation7], 0  ;;  %s411_s12 = smov [#allocation2]   ;;  %s339_s16 = scalar_lea.hbm %s555_s0, 256 }
   0x3   :  { %s21_s13 = sshll.u32 %s411_s12, 4  ;;  %p340_p0 = scmp.ne.s32.totalorder %s555_s0, %s339_s16  ;;  %s22_s13 = int_to_ptr.vmem [resolvable:$true] %s21_s13 }
   0x4   :  { %p343_p1 = scmp.lt.u32.totalorder %s339_s16, %s555_s0 }
   0x6   :  { %p345_p2 = pnand %p343_p1, %p340_p0 }
   0x8   :  { %348 = shalt.err (!%p345_p2)
}
   0x9   :  { %s349_s21 = scalar_lea.vmem %s22_s13, 256  ;;  %p354_p4 = scmp.lt.s32.totalorder %s22_s13, %s22_s13 }
   0xa   :  { %p350_p3 = scmp.ne.s32.totalorder %s22_s13, %s349_s21  ;;  %p355_p5 = scmp.lt.s32.totalorder %s349_s21, %s349_s21 }
   0xc   :  { %p356_p6 = por %p355_p5, %p354_p4 }
   0xe   :  { %p357_p7 = pnand %p356_p6, %p350_p3 }
  0x10   :  { %360 = shalt.err (!%p357_p7)
}
  0x11   :  { %s412_s22 = smov 128   ;;  %s413_s23 = smov 8  }
  0x12   :  { %27 = dma.hbm_to_vmem [thread:$0]  %s555_s0, 256, %s22_s13, [#allocation3], %s412_s22, %s412_s22, %s413_s23  }
  0x13   :  { %405 = dma.done.wait [#allocation3], 256  }
  0x14   :  { %406 = vsyncadd [#allocation3], 4294967040  ;;  %vm58_vm0 = vcmask 25600   ;;  %v162_v0 = vlaneseq  ;;  %v414_v1 = vmov 0.0   ;;  %v415_v3 = vmov 1966171168  }
  0x15   :  { %59 = vst.msk [vmem:[#allocation5] sm:$0x3] %vm58_vm0, %v414_v1  ;;  %60 = vst.msk [vmem:[#allocation6] sm:$0x3] %vm58_vm0, %v414_v1  ;;  %v165_v4 = vunpack.c.l.s4 %v415_v3  ;;  %vm71_vm1 = vcmask 1043456   ;;  %v61_v8 = vld [vmem:[#allocation2] sm:$0xff] }
  0x16   :  { %v453_v2 = vshrl.u32 %v162_v0, 7  ;;  %v63_v7 = vld [vmem:[%s556_s1] sm:$0x3]  ;;  %v62_v9 = vld [vmem:[#allocation2 + $0x8] sm:$0xff]  ;;  %v67_v11 = vcombine.high %v61_v8, %v61_v8  ;;  %v72_v12 = vsel %vm71_vm1, %v61_v8, -inf  ;;  %vm239_vm6 = vcmask 1041409  }
  0x17   :  { %v166_v5 = vunpack.c.0.s8 %v165_v4  ;;  %v64_v10 = vunpack.c.0.s8 %v63_v7  ;;  %v68_v13 = vcombine.high %v62_v9, %v62_v9  ;;  %v73_v16 = vrot.slane %v72_v12, 4  ;;  %s416_s1 = smov [#allocation6]   ;;  %s417_s28 = smov [#allocation5]  }
  0x18   :  { %v188_v14 = vsub.s32 0, %v453_v2  ;;  %v192_v15 = vsub.s32 1, %v453_v2  ;;  %v86_v17 = vsel %vm71_vm1, %v62_v9, -inf  ;;  %v79_v19 = vsel %vm71_vm1, %v67_v11, -inf  ;;  %s302_s27 = sshll.u32 %s416_s1, 4  ;;  %s292_s29 = sshll.u32 %s417_s28, 4  ;;  %s303_s27 = int_to_ptr.vmem [resolvable:$true] %s302_s27  ;;  %s293_s29 = int_to_ptr.vmem [resolvable:$true] %s292_s29 }
  0x19   :  { %v169_v6 = vsub.s32 %v166_v5, %v453_v2  ;;  %v87_v20 = vrot.slane %v86_v17, 4  ;;  %v93_v21 = vsel %vm71_vm1, %v68_v13, -inf  ;;  %v74_v22 = vmax.f32 %v72_v12, %v73_v16  ;;  %s361_s30 = scalar_lea.vmem %s303_s27, 32  ;;  %p366_p9 = scmp.lt.s32.totalorder %s303_s27, %s303_s27 }
  0x1a   :  { %v80_v23 = vrot.slane %v79_v19, 4  ;;  %v94_v24 = vrot.slane %v93_v21, 4  ;;  %v230_v5 = vand.u32 127, %v162_v0  ;;  %p362_p8 = scmp.ne.s32.totalorder %s303_s27, %s361_s30  ;;  %p367_p10 = scmp.lt.s32.totalorder %s361_s30, %s361_s30 }
  0x1b   :  { %v170_v18 = vrot.slane %v64_v10, %v169_v6  ;;  %v88_v27 = vmax.f32 %v86_v17, %v87_v20  ;;  %v75_v28 = vrot.slane %v74_v22, 2 }
  0x1c   :  { %v81_v29 = vmax.f32 %v79_v19, %v80_v23  ;;  %v95_v30 = vmax.f32 %v93_v21, %v94_v24  ;;  %p368_p11 = por %p367_p10, %p366_p9 }
  0x1d   :  { %v178_v25 = vrot.slane %v170_v18, %v169_v6  ;;  %v171_v26 = vcombine.high %v170_v18, %v170_v18  ;;  %v76_v34 = vmax.f32 %v74_v22, %v75_v28  ;;  %v89_v36 = vrot.slane %v88_v27, 2 }
  0x1e   :  { %v82_v35 = vrot.slane %v81_v29, 2  ;;  %v96_v37 = vrot.slane %v95_v30, 2  ;;  %p369_p12 = pnand %p368_p11, %p362_p8 }
  0x1f   :  { %v465_v31 = vrot.slane %v178_v25, %v188_v14  ;;  %v467_v32 = vrot.slane %v178_v25, %v192_v15  ;;  %v185_v33 = vrot.slane %v171_v26, %v169_v6  ;;  %v77_v42 = vrot.slane %v76_v34, 1 }
  0x20   :  { %v83_v43 = vmax.f32 %v81_v29, %v82_v35  ;;  %v90_v52 = vmax.f32 %v88_v27, %v89_v36  ;;  %v97_v53 = vmax.f32 %v95_v30, %v96_v37  ;;  %v499_v6 = vsub.s32 %v230_v5, %v453_v2 }
  0x21   :  { %vm202_vm2 = vcmp.eq.s32.totalorder %v453_v2, %v465_v31  ;;  %vm203_vm3 = vcmp.eq.s32.totalorder %v453_v2, %v467_v32  ;;  %v473_v38 = vrot.slane %v185_v33, %v188_v14  ;;  %v475_v39 = vrot.slane %v185_v33, %v192_v15 }
  0x22   :  { %v256_v40 = vsel %vm202_vm2, 1.0, %v414_v1  ;;  %v257_v41 = vsel %vm203_vm3, 1.0, %v414_v1  ;;  %v78_v47 = vmax.f32 %v76_v34, %v77_v42  ;;  %v84_v48 = vrot.slane %v83_v43, 1 }
  0x23   :  { %v260_v44 = vsel %vm71_vm1, %v256_v40, 0.0  ;;  %v261_v45 = vsel %vm71_vm1, %v257_v41, 0.0  ;;  %vm204_vm4 = vcmp.eq.s32.totalorder %v453_v2, %v473_v38  ;;  %vm205_vm5 = vcmp.eq.s32.totalorder %v453_v2, %v475_v39 }
  0x24   :  { %v262_v46 = vadd.f32 %v261_v45, %v260_v44  ;;  %v258_v49 = vsel %vm204_vm4, 1.0, %v414_v1  ;;  %v259_v50 = vsel %vm205_vm5, 1.0, %v414_v1  ;;  %v85_v54 = vmax.f32 %v83_v43, %v84_v48 }
  0x25   :  { %v265_v51 = vsel %vm71_vm1, %v258_v49, 0.0  ;;  %v266_v55 = vsel %vm71_vm1, %v259_v50, 0.0  ;;  %v91_v57 = vrot.slane %v90_v52, 1  ;;  %v98_v58 = vrot.slane %v97_v53, 1 }
  0x26   :  { %263 = vadd.xlane.f32.xlu1 %v262_v46  ;;  %v267_v56 = vadd.f32 %v266_v55, %v265_v51  ;;  %v104_v59 = vcombine.low %v78_v47, %v85_v54 }
  0x27   :  { %v92_v60 = vmax.f32 %v90_v52, %v91_v57  ;;  %v99_v61 = vmax.f32 %v97_v53, %v98_v58 }
  0x28   :  { %v108_v62 = vsub.f32 %v61_v8, %v104_v59 }
  0x29   :  { %v105_v63 = vcombine.low %v92_v60, %v99_v61 }
  0x2a   :  { %268 = vadd.xlane.f32.xlu1 %v267_v56  ;;  %v110_v3 = vmul.f32 1.442695, %v108_v62 }
  0x2b   :  { %v109_v4 = vsub.f32 %v62_v9, %v105_v63 }
  0x2c   :  { %327 = vpow2.f32 %v110_v3 }
  0x2d   :  { %v112_v1 = vmul.f32 1.442695, %v109_v4 }
  0x2f   :  { %329 = vpow2.f32 %v112_v1 }
  0x36   :  { %v328_v7 = vpop.eup %327 }
  0x37   :  { %v116_v10 = vcombine.high %v328_v7, %v328_v7  ;;  %v120_v11 = vsel %vm71_vm1, %v328_v7, 0.0 }
  0x38   :  { %v121_v12 = vrot.slane %v120_v11, 4 }
  0x39   :  { %v330_v13 = vpop.eup %329  ;;  %v127_v8 = vsel %vm71_vm1, %v116_v10, 0.0 }
  0x3a   :  { %v122_v14 = vadd.f32 %v121_v12, %v120_v11  ;;  %v128_v15 = vrot.slane %v127_v8, 4  ;;  %v117_v16 = vcombine.high %v330_v13, %v330_v13  ;;  %v134_v9 = vsel %vm71_vm1, %v330_v13, 0.0  ;;  %v245_v12 = vld [vmem:[#allocation6] sm:$0x3] }
  0x3b   :  { %v135_v17 = vrot.slane %v134_v9, 4 }
  0x3c   :  { %v123_v18 = vrot.slane %v122_v14, 2  ;;  %v129_v19 = vadd.f32 %v128_v15, %v127_v8  ;;  %v141_v0 = vsel %vm71_vm1, %v117_v16, 0.0  ;;  %v206_v16 = vld [vmem:[#allocation5] sm:$0x3] }
  0x3d   :  { %v136_v20 = vadd.f32 %v135_v17, %v134_v9  ;;  %v142_v21 = vrot.slane %v141_v0, 4 }
  0x3e   :  { %v124_v22 = vadd.f32 %v123_v18, %v122_v14  ;;  %v130_v23 = vrot.slane %v129_v19, 2 }
  0x3f   :  { %v137_v24 = vrot.slane %v136_v20, 2  ;;  %v143_v25 = vadd.f32 %v142_v21, %v141_v0 }
  0x40   :  { %v125_v26 = vrot.slane %v124_v22, 1  ;;  %v131_v27 = vadd.f32 %v130_v23, %v129_v19 }
  0x41   :  { %v138_v28 = vadd.f32 %v137_v24, %v136_v20  ;;  %v144_v29 = vrot.slane %v143_v25, 2 }
  0x42   :  { %v126_v30 = vadd.f32 %v125_v26, %v124_v22  ;;  %v132_v33 = vrot.slane %v131_v27, 1 }
  0x43   :  { %v139_v34 = vrot.slane %v138_v28, 1  ;;  %v145_v35 = vadd.f32 %v144_v29, %v143_v25 }
  0x44   :  { %v133_v36 = vadd.f32 %v132_v33, %v131_v27  ;;  %331 = vrcp.f32 %v126_v30 }
  0x45   :  { %v140_v37 = vadd.f32 %v139_v34, %v138_v28  ;;  %v146_v40 = vrot.slane %v145_v35, 1 }
  0x46   :  { %333 = vrcp.f32 %v133_v36 }
  0x47   :  { %v147_v41 = vadd.f32 %v146_v40, %v145_v35  ;;  %335 = vrcp.f32 %v140_v37 }
  0x49   :  { %337 = vrcp.f32 %v147_v41 }
  0x4e   :  { %v332_v42 = vpop.eup %331 }
  0x50   :  { %v334_v43 = vpop.eup %333 }
  0x51   :  { %v336_v44 = vpop.eup %335  ;;  %v156_v45 = vcombine.low %v332_v42, %v334_v43 }
  0x53   :  { %v338_v46 = vpop.eup %337  ;;  %v160_v47 = vmul.f32 %v328_v7, %v156_v45 }
  0x54   :  { %v157_v48 = vcombine.low %v336_v44, %v338_v46 }
  0x55   :  { %v209_v49 = vcombine.high %v160_v47, %v160_v47  ;;  %v246_v50 = vsel %vm71_vm1, %v160_v47, 0.0  ;;  %v213_v53 = vsel %vm202_vm2, %v160_v47, 0.0 }
  0x56   :  { %v161_v51 = vmul.f32 %v330_v13, %v157_v48  ;;  %v217_v62 = vsel %vm71_vm1, %v213_v53, 0.0 }
  0x57   :  { %v247_v52 = vsel %vm71_vm1, %v209_v49, 0.0  ;;  %v214_v54 = vsel %vm203_vm3, %v209_v49, 0.0 }
  0x58   :  { %v248_v55 = vadd.f32 %v247_v52, %v246_v50  ;;  %v210_v56 = vcombine.high %v161_v51, %v161_v51  ;;  %v251_v57 = vsel %vm71_vm1, %v161_v51, 0.0  ;;  %v215_v58 = vsel %vm204_vm4, %v161_v51, 0.0 }
  0x59   :  { %v222_v59 = vsel %vm71_vm1, %v215_v58, 0.0  ;;  %v218_v63 = vsel %vm71_vm1, %v214_v54, 0.0 }
  0x5a   :  { %249 = vadd.xlane.f32.xlu0 %v248_v55  ;;  %v252_v60 = vsel %vm71_vm1, %v210_v56, 0.0  ;;  %v216_v31 = vsel %vm205_vm5, %v210_v56, 0.0  ;;  %v219_v38 = vadd.f32 %v218_v63, %v217_v62 }
  0x5b   :  { %v253_v61 = vadd.f32 %v252_v60, %v251_v57  ;;  %v223_v32 = vsel %vm71_vm1, %v216_v31, 0.0 }
  0x5c   :  { %v224_v3 = vadd.f32 %v223_v32, %v222_v59 }
  0x5e   :  { %254 = vadd.xlane.f32.xlu0 %v253_v61  ;;  %225 = vadd.xlane.f32.xlu1 %v224_v3 }
  0x62   :  { %220 = vadd.xlane.f32.xlu0 %v219_v38 }
  0xb3   :  { %v264_v4 = vpop.xlane.xlu1 %263 }
  0xb7   :  { %v269_v1 = vpop.xlane.xlu1 %268 }
  0xe7   :  { %v250_v5 = vpop.xlane.xlu0 %249 }
  0xe8   :  { %v270_v7 = vadd.f32 %v264_v4, %v250_v5 }
  0xea   :  { %v277_v39 = vrot.slane %v270_v7, %v499_v6 }
  0xeb   :  { %v255_v10 = vpop.xlane.xlu0 %254  ;;  %v226_v11 = vpop.xlane.xlu1 %225 }
  0xec   :  { %v271_v2 = vadd.f32 %v269_v1, %v255_v10  ;;  %v238_v8 = vrot.slane %v226_v11, %v499_v6 }
  0xee   :  { %v281_v13 = vrot.slane %v271_v2, %v499_v6 }
  0xef   :  { %v221_v14 = vpop.xlane.xlu0 %220 }
  0xf0   :  { %v282_v15 = vsel %vm239_vm6, %v281_v13, %v277_v39  ;;  %v234_v9 = vrot.slane %v221_v14, %v499_v6 }
  0xf1   :  { %v284_v17 = vadd.f32 %v282_v15, %v245_v12 }
  0xf2   :  { %v240_v18 = vsel %vm239_vm6, %v238_v8, %v234_v9 }
  0xf3   :  { %285 = vst.msk [vmem:[#allocation6] sm:$0x3] %vm58_vm0, %v284_v17  ;;  %v242_v19 = vadd.f32 %v240_v18, %v206_v16 }
  0xf4   :  { %372 = shalt.err (!%p369_p12)
}
  0xf5   :  { %s373_s6 = scalar_lea.hbm %s558_s3, 32 }
  0xf6   :  { %p374_p13 = scmp.ne.s32.totalorder %s558_s3, %s373_s6  ;;  %p377_p0 = scmp.lt.u32.totalorder %s373_s6, %s558_s3 }
  0xf8   :  { %p379_p1 = pnand %p377_p0, %p374_p13 }
  0xfa   :  { %382 = shalt.err (!%p379_p1)
}
  0xfb   :  { %305 = dma.vmem_to_hbm [thread:$0]  %s303_s27, 32, %s558_s3, [#allocation7]   ;;  %244 = vst.msk [vmem:[#allocation5] sm:$0x3] %vm58_vm0, %v242_v19 }
  0xfc   :  { %s383_s13 = scalar_lea.vmem %s293_s29, 32  ;;  %p388_p3 = scmp.lt.s32.totalorder %s293_s29, %s293_s29 }
  0xfd   :  { %p384_p2 = scmp.ne.s32.totalorder %s293_s29, %s383_s13  ;;  %p389_p4 = scmp.lt.s32.totalorder %s383_s13, %s383_s13 }
  0xff   :  { %p390_p5 = por %p389_p4, %p388_p3 }
 0x101   :  { %p391_p6 = pnand %p390_p5, %p384_p2 }
 0x103   :  { %394 = shalt.err (!%p391_p6)
}
 0x104   :  { %s395_s16 = scalar_lea.hbm %s557_s2, 32 }
 0x105   :  { %p396_p7 = scmp.ne.s32.totalorder %s557_s2, %s395_s16  ;;  %p399_p8 = scmp.lt.u32.totalorder %s395_s16, %s557_s2 }
 0x107   :  { %p401_p9 = pnand %p399_p8, %p396_p7 }
 0x109   :  { %404 = shalt.err (!%p401_p9)
}
 0x10a   :  { %295 = dma.vmem_to_hbm [thread:$0]  %s293_s29, 32, %s557_s2, [#allocation4]  }
 0x10b   :  { %407 = dma.done.wait [#allocation4], 32  }
 0x10c   :  { %408 = vsyncadd [#allocation4], 4294967264 }
 0x10d   :  { %409 = dma.done.wait [#allocation7], 32  }
 0x10e   :  { %410 = vsyncadd [#allocation7], 4294967264 }
 0x10f   :  { %312 = vsyncpa [#allocation3], 1 }
 0x110   :  { %313 = vsyncpa [#allocation4], 1 }
 0x111   :  { %314 = vsyncpa [#allocation7], 1 }

</bundles_post_ra>
